<compile_context>
chip_gen: v7x
topology: tpu7x:2x2x1
jax: 0.10.0
libtpu: 0.0.40
codegen_flags: <defaults>
</compile_context>

<pallas_src>
import functools

import jax
import jax.numpy as jnp
from jax.experimental import pallas as pl
from jax.experimental.pallas import tpu as pltpu


# --------------------------------------------------------------------------
# Kernels
# --------------------------------------------------------------------------
def _ffn_kernel_resident(x_ref, w1_ref, b1_ref, w2_ref, b2_ref, o_ref):
    # x_ref: (tm, d_model); w1_ref: (d_model, d_ff); b1_ref: (1, d_ff)
    # w2_ref: (d_ff, d_model); b2_ref: (1, d_model); o_ref: (tm, d_model)
    h = jnp.dot(x_ref[...], w1_ref[...], preferred_element_type=jnp.float32)
    h = jnp.maximum(h + b1_ref[...].astype(jnp.float32), 0.0)
    acc = jnp.dot(h.astype(w2_ref.dtype), w2_ref[...],
                  preferred_element_type=jnp.float32)
    o_ref[...] = (acc + b2_ref[...].astype(jnp.float32)).astype(o_ref.dtype)


def _ffn_kernel_chunked(x_ref, w1_ref, b1_ref, w2_ref, b2_ref, o_ref, acc_ref):
    # Same as above but W1/b1/W2 are chunked along d_ff (grid axis 1);
    # acc_ref: (tm, d_model) f32 scratch carries partial sums over d_ff.
    k = pl.program_id(1)

    @pl.when(k == 0)
    def _():
        acc_ref[...] = jnp.zeros_like(acc_ref)

    # bias1 + ReLU are elementwise over d_ff -> per-chunk application is exact.
    h = jnp.dot(x_ref[...], w1_ref[...], preferred_element_type=jnp.float32)
    h = jnp.maximum(h + b1_ref[...].astype(jnp.float32), 0.0)
    acc_ref[...] += jnp.dot(h.astype(w2_ref.dtype), w2_ref[...],
                            preferred_element_type=jnp.float32)

    @pl.when(k == pl.num_programs(1) - 1)
    def _():
        o_ref[...] = (acc_ref[...]
                      + b2_ref[...].astype(jnp.float32)).astype(o_ref.dtype)


# --------------------------------------------------------------------------
# Tiling helpers
# --------------------------------------------------------------------------
def _round_up(x, n):
    return ((x + n - 1) // n) * n


def _vmem_capacity_bytes():
    """Physical VMEM per TensorCore; conservative 64 MiB (v7x) if unknown."""
    try:
        return int(pltpu.get_tpu_info().vmem_capacity_bytes)
    except Exception:
        return 64 * 1024 * 1024


def _pick_tm(m, tm_req):
    """M tile.  Small inputs: one tile rounded to 16 (bf16 packed sublanes).
    Large inputs: multiple of 256 (MXU height), kept to >= 2 blocks so both
    v7x TensorCores get work."""
    if m < 512:
        return _round_up(m, 16)
    tm = max(256, min(_round_up(tm_req, 256), 1024))
    while tm > 256 and pl.cdiv(m, tm) < 2:
        tm //= 2
    return tm


def _pick_tf_and_pad(d_ff, tf_req):
    """d_ff chunk size (multiple of 256, or 128 if tf_req < 256) and the
    zero-padded d_ff it divides, minimizing padding."""
    if d_ff <= tf_req:
        tf = _round_up(d_ff, 128)
        return tf, tf
    step = 256 if tf_req >= 256 else 128
    tf_max = max(step, (tf_req // step) * step)
    best_tf, best_pad = tf_max, _round_up(d_ff, tf_max)
    for cand in range(tf_max, step - 1, -step):
        pad = _round_up(d_ff, cand)
        if pad < best_pad:
            best_tf, best_pad = cand, pad
    return best_tf, best_pad


# --------------------------------------------------------------------------
# Wrapper
# --------------------------------------------------------------------------
@functools.partial(jax.jit, static_argnames=("tm", "tf", "path"))
def position_wise_ffn(x, w1, b1, w2, b2, *, tm=1024, tf=1024, path="auto"):
    """x: (batch, seq, d_model) -> (batch, seq, d_model).

    w1: (d_model, d_ff), b1: (d_ff,), w2: (d_ff, d_model), b2: (d_model,)
    (pre-transposed vs. torch.nn.Linear).  For best throughput on all TPU
    generations feed bf16 activations/weights (f32 accumulation is kept
    inside the kernel) and use d_model that is a multiple of 128.
    `path` in {"auto", "resident", "chunked"}; non-auto is mainly for tests.
    """
    batch, seq, d_model = x.shape
    d_ff = w1.shape[1]
    m = batch * seq
    itemsize = x.dtype.itemsize

    vmem_cap = _vmem_capacity_bytes()
    budget = max(vmem_cap - 16 * 1024 * 1024, 24 * 1024 * 1024)

    tm_eff = _pick_tm(m, tm)

    def resident_bytes(tm_):
        # Double-buffered x/out tiles + weights (counted x2 conservatively,
        # though constant index maps DMA them only once) + f32 temporaries.
        return (2 * itemsize * (2 * tm_ * d_model + d_model * d_ff + d_ff
                                + d_ff * d_model + d_model)
                + 4 * tm_ * (d_ff + d_model))

    def chunked_bytes(tm_, tf_):
        return (2 * itemsize * (2 * tm_ * d_model + d_model * tf_ + tf_
                                + tf_ * d_model + d_model)
                + 4 * tm_ * d_model               # f32 accumulator scratch
                + 4 * tm_ * (tf_ + d_model))      # f32 h + pre-cast temporaries

    use_resident = (path == "resident"
                    or (path == "auto" and resident_bytes(tm_eff) <= budget))
    if path == "auto" and not use_resident:
        # A smaller M tile is worth it if it keeps the weights resident
        # (avoids re-streaming W1/W2 from HBM once per M block).
        tm_try = tm_eff
        while tm_try > 256:
            tm_try = max(256, tm_try // 2)
            if resident_bytes(tm_try) <= budget:
                tm_eff, use_resident = tm_try, True
                break

    if use_resident:
        tf_eff, d_ff_pad = d_ff, d_ff
    else:
        tf_eff, d_ff_pad = _pick_tf_and_pad(d_ff, tf)
        # Re-budget: shrink the d_ff chunk first (keeps the MXU-height M
        # tile), then the M tile.
        while chunked_bytes(tm_eff, tf_eff) > budget and tf_eff > 256:
            tf_eff = max(256, (tf_eff // 2) // 128 * 128)
            d_ff_pad = _round_up(d_ff, tf_eff)
        while chunked_bytes(tm_eff, tf_eff) > budget and tm_eff > 256:
            tm_eff = max(256, tm_eff // 2)

    footprint = (resident_bytes(tm_eff) if use_resident
                 else chunked_bytes(tm_eff, tf_eff))

    # ---- data prep: pad ragged M and (chunked path) odd d_ff --------------
    m_pad = pl.cdiv(m, tm_eff) * tm_eff
    x2d = x.reshape(m, d_model)
    if m_pad != m:
        x2d = jnp.pad(x2d, ((0, m_pad - m), (0, 0)))
    if d_ff_pad != d_ff:
        # Zero columns of W1 / zeros of b1 give h=relu(0)=0, and zero rows of
        # W2 contribute 0 to the output -> exact.
        w1 = jnp.pad(w1, ((0, 0), (0, d_ff_pad - d_ff)))
        b1 = jnp.pad(b1, ((0, d_ff_pad - d_ff),))
        w2 = jnp.pad(w2, ((0, d_ff_pad - d_ff), (0, 0)))
    b1_2d = b1.reshape(1, d_ff_pad)
    b2_2d = b2.reshape(1, d_model)

    n_m_blocks = m_pad // tm_eff

    if use_resident:
        grid = (n_m_blocks,)
        in_specs = [
            pl.BlockSpec((tm_eff, d_model), lambda i: (i, 0)),     # x tile
            pl.BlockSpec((d_model, d_ff_pad), lambda i: (0, 0)),   # W1 resident
            pl.BlockSpec((1, d_ff_pad), lambda i: (0, 0)),         # b1 resident
            pl.BlockSpec((d_ff_pad, d_model), lambda i: (0, 0)),   # W2 resident
            pl.BlockSpec((1, d_model), lambda i: (0, 0)),          # b2 resident
        ]
        out_specs = pl.BlockSpec((tm_eff, d_model), lambda i: (i, 0))
        scratch_shapes = []
        kernel = _ffn_kernel_resident
        dim_sem = ("parallel",)
    else:
        grid = (n_m_blocks, d_ff_pad // tf_eff)
        in_specs = [
            pl.BlockSpec((tm_eff, d_model), lambda i, k: (i, 0)),   # x tile
            pl.BlockSpec((d_model, tf_eff), lambda i, k: (0, k)),   # W1 chunk
            pl.BlockSpec((1, tf_eff), lambda i, k: (0, k)),         # b1 chunk
            pl.BlockSpec((tf_eff, d_model), lambda i, k: (k, 0)),   # W2 chunk
            pl.BlockSpec((1, d_model), lambda i, k: (0, 0)),        # b2
        ]
        # TODO(synk): if xprof shows exposed weight-DMA latency on this path,
        # add pipeline_mode=pl.Buffered(3) to the W1/W2 chunk specs only.
        out_specs = pl.BlockSpec((tm_eff, d_model), lambda i, k: (i, 0))
        scratch_shapes = [pltpu.VMEM((tm_eff, d_model), jnp.float32)]
        kernel = _ffn_kernel_chunked
        dim_sem = ("parallel", "arbitrary")

    # VMEM limit from the actual footprint, capped at physical capacity minus
    # compiler headroom (v7x has only 64 MiB per TensorCore).
    vmem_limit = int(min(max(footprint + 8 * 1024 * 1024, 32 * 1024 * 1024),
                         max(vmem_cap - 8 * 1024 * 1024, footprint)))

    weight_passes = 1 if use_resident else n_m_blocks
    cost = pl.CostEstimate(
        flops=2 * 2 * m_pad * d_model * d_ff_pad,        # two matmuls
        transcendentals=0,
        bytes_accessed=int(itemsize * (2 * m * d_model                       # x, out
                                       + weight_passes * 2 * d_model * d_ff_pad
                                       + d_ff_pad + d_model)),               # biases
    )

    out2d = pl.pallas_call(
        kernel,
        out_shape=jax.ShapeDtypeStruct((m_pad, d_model), x.dtype),
        grid_spec=pltpu.PrefetchScalarGridSpec(
            num_scalar_prefetch=0,
            grid=grid,
            in_specs=in_specs,
            out_specs=out_specs,
            scratch_shapes=scratch_shapes,
        ),
        compiler_params=pltpu.CompilerParams(
            dimension_semantics=dim_sem,
            vmem_limit_bytes=vmem_limit,
        ),
        cost_estimate=cost,
    )(x2d, w1, b1_2d, w2, b2_2d)

    if m_pad != m:
        out2d = out2d[:m]
    return out2d.reshape(batch, seq, d_model)


# --------------------------------------------------------------------------
# Pure-JAX reference
# --------------------------------------------------------------------------
def _ref_ffn(x, w1, b1, w2, b2):
    h = jnp.maximum(jnp.einsum("bsd,df->bsf", x.astype(jnp.float32),
                               w1.astype(jnp.float32)) + b1.astype(jnp.float32),
                    0.0)
    return jnp.einsum("bsf,fd->bsd", h, w2.astype(jnp.float32)) \
        + b2.astype(jnp.float32)


if __name__ == "__main__":
    key = jax.random.PRNGKey(0)

    # --- 1. Small toy shape (auto -> resident-weights path) ----------------
    batch, seq, d_model, d_ff = 2, 8, 32, 64
    kx, kw1, kb1, kw2, kb2 = jax.random.split(key, 5)
    x = jax.random.normal(kx, (batch, seq, d_model), dtype=jnp.float32)
    # nn.Linear(d_model, d_ff) / nn.Linear(d_ff, d_model), stored transposed.
    w1 = jax.random.normal(kw1, (d_model, d_ff), dtype=jnp.float32) * 0.1
    b1 = jax.random.normal(kb1, (d_ff,), dtype=jnp.float32) * 0.1
    w2 = jax.random.normal(kw2, (d_ff, d_model), dtype=jnp.float32) * 0.1
    b2 = jax.random.normal(kb2, (d_model,), dtype=jnp.float32) * 0.1

    out = position_wise_ffn(x, w1, b1, w2, b2)
    jax.block_until_ready(out)
    ref = _ref_ffn(x, w1, b1, w2, b2)
    assert out.shape == (batch, seq, d_model)
    assert jnp.allclose(out, ref, atol=1e-5, rtol=1e-5), "f32 mismatch vs reference"

    # --- 2. Lane-dense + ragged-M (d_model multiple of 128, m % 16 != 0) ---
    batch2, seq2, d_model2, d_ff2 = 2, 10, 128, 256
    k2 = jax.random.split(key, 6)
    x2 = jax.random.normal(k2[0], (batch2, seq2, d_model2), dtype=jnp.float32)
    w1b = jax.random.normal(k2[1], (d_model2, d_ff2), dtype=jnp.float32) * 0.05
    b1b = jax.random.normal(k2[2], (d_ff2,), dtype=jnp.float32) * 0.05
    w2b = jax.random.normal(k2[3], (d_ff2, d_model2), dtype=jnp.float32) * 0.05
    b2b = jax.random.normal(k2[4], (d_model2,), dtype=jnp.float32) * 0.05

    out2 = position_wise_ffn(x2, w1b, b1b, w2b, b2b)
    jax.block_until_ready(out2)
    ref2 = _ref_ffn(x2, w1b, b1b, w2b, b2b)
    assert jnp.allclose(out2, ref2, atol=1e-4, rtol=1e-4), "padded-M mismatch"

    # --- 3. bf16 inputs/weights (MXU fast path; f32 accumulation kept) -----
    out_bf16 = position_wise_ffn(x2.astype(jnp.bfloat16),
                                 w1b.astype(jnp.bfloat16),
                                 b1b.astype(jnp.bfloat16),
                                 w2b.astype(jnp.bfloat16),
                                 b2b.astype(jnp.bfloat16))
    jax.block_until_ready(out_bf16)
    ref_bf16 = _ref_ffn(x2.astype(jnp.bfloat16), w1b.astype(jnp.bfloat16),
                        b1b.astype(jnp.bfloat16), w2b.astype(jnp.bfloat16),
                        b2b.astype(jnp.bfloat16))
    assert jnp.allclose(out_bf16.astype(jnp.float32), ref_bf16,
                        atol=5e-2, rtol=5e-2), "bf16 mismatch"

    # --- 4. Forced d_ff-chunked fallback (2 k-steps, accumulator path) -----
    out_chunk = position_wise_ffn(x2, w1b, b1b, w2b, b2b, tf=128, path="chunked")
    jax.block_until_ready(out_chunk)
    assert jnp.allclose(out_chunk, ref2, atol=1e-4, rtol=1e-4), "chunked-path mismatch"

    # --- 5. Forced chunked path with odd d_ff (zero-padded hidden dim) -----
    d_ff3 = 200
    k3 = jax.random.split(key, 4)
    w1c = jax.random.normal(k3[0], (d_model2, d_ff3), dtype=jnp.float32) * 0.05
    b1c = jax.random.normal(k3[1], (d_ff3,), dtype=jnp.float32) * 0.05
    w2c = jax.random.normal(k3[2], (d_ff3, d_model2), dtype=jnp.float32) * 0.05
    out3 = position_wise_ffn(x2, w1c, b1c, w2c, b2b, tf=128, path="chunked")
    jax.block_until_ready(out3)
    ref3 = _ref_ffn(x2, w1c, b1c, w2c, b2b)
    assert jnp.allclose(out3, ref3, atol=1e-4, rtol=1e-4), "odd-d_ff padding mismatch"

    print("KERNEL_OK")
</pallas_src>

<mosaic_0001>
module attributes {stable_mosaic.version = 11 : i64} {
  func.func @_ffn_kernel_resident(%arg0: i32, %arg1: memref<16x32xf32, #tpu.memory_space<vmem>>, %arg2: memref<32x64xf32, #tpu.memory_space<vmem>>, %arg3: memref<1x64xf32, #tpu.memory_space<vmem>>, %arg4: memref<64x32xf32, #tpu.memory_space<vmem>>, %arg5: memref<1x32xf32, #tpu.memory_space<vmem>>, %arg6: memref<16x32xf32, #tpu.memory_space<vmem>>) attributes {dimension_semantics = [#tpu.dimension_semantics<parallel>], iteration_bounds = array<i64: 1>, scalar_prefetch = 0 : i64, scratch_operands = 0 : i64, tpu.core_type = #tpu.core_type<tc>, window_params = [{transform_indices = @transform_0, window_bounds = array<i64: 16, 32>}, {pipeline_mode = #tpu.pipeline_mode<synchronous>, transform_indices = @transform_1, window_bounds = array<i64: 32, 64>}, {pipeline_mode = #tpu.pipeline_mode<synchronous>, transform_indices = @transform_2, window_bounds = array<i64: 1, 64>}, {pipeline_mode = #tpu.pipeline_mode<synchronous>, transform_indices = @transform_3, window_bounds = array<i64: 64, 32>}, {pipeline_mode = #tpu.pipeline_mode<synchronous>, transform_indices = @transform_4, window_bounds = array<i64: 1, 32>}, {transform_indices = @transform_5, window_bounds = array<i64: 16, 32>}]} {
    %c0 = arith.constant 0 : index
    %c0_0 = arith.constant 0 : index
    %0 = vector.load %arg1[%c0, %c0_0] : memref<16x32xf32, #tpu.memory_space<vmem>>, vector<16x32xf32>
    %c0_1 = arith.constant 0 : index
    %c0_2 = arith.constant 0 : index
    %1 = vector.load %arg2[%c0_1, %c0_2] : memref<32x64xf32, #tpu.memory_space<vmem>>, vector<32x64xf32>
    %cst = arith.constant dense<0.000000e+00> : vector<16x64xf32>
    %2 = tpu.matmul %0, %1, %cst {dimension_numbers = #tpu.dot_dimension_numbers<[1], [0], [0], [1], [0, 0, 1, 1], [], []>} : vector<16x32xf32>, vector<32x64xf32>, vector<16x64xf32> -> vector<16x64xf32>
    %c0_3 = arith.constant 0 : index
    %c0_4 = arith.constant 0 : index
    %3 = vector.load %arg3[%c0_3, %c0_4] : memref<1x64xf32, #tpu.memory_space<vmem>>, vector<1x64xf32>
    %4 = vector.broadcast %3 : vector<1x64xf32> to vector<16x64xf32>
    %5 = arith.addf %2, %4 : vector<16x64xf32>
    %cst_5 = arith.constant 0.000000e+00 : f32
    %6 = vector.broadcast %cst_5 : f32 to vector<16x64xf32>
    %7 = arith.maximumf %5, %6 : vector<16x64xf32>
    %c0_6 = arith.constant 0 : index
    %c0_7 = arith.constant 0 : index
    %8 = vector.load %arg4[%c0_6, %c0_7] : memref<64x32xf32, #tpu.memory_space<vmem>>, vector<64x32xf32>
    %cst_8 = arith.constant dense<0.000000e+00> : vector<16x32xf32>
    %9 = tpu.matmul %7, %8, %cst_8 {dimension_numbers = #tpu.dot_dimension_numbers<[1], [0], [0], [1], [0, 0, 1, 1], [], []>} : vector<16x64xf32>, vector<64x32xf32>, vector<16x32xf32> -> vector<16x32xf32>
    %c0_9 = arith.constant 0 : index
    %c0_10 = arith.constant 0 : index
    %10 = vector.load %arg5[%c0_9, %c0_10] : memref<1x32xf32, #tpu.memory_space<vmem>>, vector<1x32xf32>
    %11 = vector.broadcast %10 : vector<1x32xf32> to vector<16x32xf32>
    %12 = arith.addf %9, %11 : vector<16x32xf32>
    %c0_11 = arith.constant 0 : index
    %c0_12 = arith.constant 0 : index
    %13 = vector.load %arg6[%c0_11, %c0_12] : memref<16x32xf32, #tpu.memory_space<vmem>>, vector<16x32xf32>
    tpu.vector_store %arg6[%c0_11, %c0_12], %12 {strides = array<i32>} : memref<16x32xf32, #tpu.memory_space<vmem>>, vector<16x32xf32>,
    return
  }
  func.func @transform_0(%arg0: i32) -> (i32, i32) {
    %c0_i32 = arith.constant 0 : i32
    %c0_i32_0 = arith.constant 0 : i32
    return %arg0, %c0_i32 : i32, i32
  }
  func.func @transform_1(%arg0: i32) -> (i32, i32) {
    %c0_i32 = arith.constant 0 : i32
    %c0_i32_0 = arith.constant 0 : i32
    %c0_i32_1 = arith.constant 0 : i32
    return %c0_i32, %c0_i32_0 : i32, i32
  }
  func.func @transform_2(%arg0: i32) -> (i32, i32) {
    %c0_i32 = arith.constant 0 : i32
    %c0_i32_0 = arith.constant 0 : i32
    %c0_i32_1 = arith.constant 0 : i32
    return %c0_i32, %c0_i32_0 : i32, i32
  }
  func.func @transform_3(%arg0: i32) -> (i32, i32) {
    %c0_i32 = arith.constant 0 : i32
    %c0_i32_0 = arith.constant 0 : i32
    %c0_i32_1 = arith.constant 0 : i32
    return %c0_i32, %c0_i32_0 : i32, i32
  }
  func.func @transform_4(%arg0: i32) -> (i32, i32) {
    %c0_i32 = arith.constant 0 : i32
    %c0_i32_0 = arith.constant 0 : i32
    %c0_i32_1 = arith.constant 0 : i32
    return %c0_i32, %c0_i32_0 : i32, i32
  }
  func.func @transform_5(%arg0: i32) -> (i32, i32) {
    %c0_i32 = arith.constant 0 : i32
    %c0_i32_0 = arith.constant 0 : i32
    return %arg0, %c0_i32 : i32, i32
  }
}

</mosaic_0001>

<bundles_post_ra>
// kernel: position_wise_ffn.1
= control target key start
LH: loop header
LB: loop body
LE: loop exit
PB: predicated region body
PF: predicated region fallthrough
CT: control target
= control target key end

     0   :  { %vm34_vm0 = vcmask 261120   ;;  %s433_s0 = inlined_call_operand.vmem [shape: f32[16,32], index: 0, kind: input, shape index: {}]   ;;  %s434_s1 = inlined_call_operand.vmem [shape: f32[32,64], index: 1, kind: input, shape index: {}]   ;;  %s435_s2 = inlined_call_operand.vmem [shape: f32[1,64], index: 2, kind: input, shape index: {}]   ;;  %s436_s3 = inlined_call_operand.vmem [shape: f32[64,32], index: 3, kind: input, shape index: {}]   ;;  %s437_s4 = inlined_call_operand.vmem [shape: f32[1,32], index: 4, kind: input, shape index: {}]   ;;  %s438_s5 = inlined_call_operand.hbm [shape: f32[16,32], index: 5, kind: output, shape index: {}]  }
   0x1   :  { %v23_v0 = vld [vmem:[%s434_s1] sm:$0xff]  ;;  %v24_v1 = vld [vmem:[%s434_s1 + $0x8] sm:$0xff]  ;;  %v25_v2 = vld [vmem:[%s434_s1 + $0x10] sm:$0xff] }
   0x2   :  { %v285_v3 = vpack.c.bf16 %v24_v1, %v23_v0  ;;  %v26_v4 = vld [vmem:[%s434_s1 + $0x18] sm:$0xff]  ;;  %v21_v5 = vld [vmem:[%s433_s0] sm:$0xff]  ;;  %v119_v8 = vld [vmem:[%s436_s3 + $0x8] sm:$0xff] }
   0x3   :  { %v289_v6 = vpack.c.bf16 %v26_v4, %v25_v2  ;;  %263 = vmatprep.mubr.msk.f32.mxu0 %vm34_vm0, %v21_v5  ;;  %v118_v7 = vld [vmem:[%s436_s3] sm:$0xff]  ;;  %v120_v9 = vld [vmem:[%s436_s3 + $0x10] sm:$0xff]  ;;  %v121_v11 = vld [vmem:[%s436_s3 + $0x18] sm:$0xff] }
   0x4   :  { %286 = vmatprep.subr.bf16.mxu0 %v285_v3  ;;  %v293_v10 = vpack.c.bf16 %v119_v8, %v118_v7  ;;  %v297_v12 = vpack.c.bf16 %v121_v11, %v120_v9  ;;  %v122_v13 = vld [vmem:[%s436_s3 + $0x20] sm:$0xff]  ;;  %v123_v14 = vld [vmem:[%s436_s3 + $0x28] sm:$0xff] }
   0x5   :  { %288 = vmatpush3.bf16.msra.mxu0 %v285_v3 }
   0x6   :  { %10 = vsyncpa [#allocation3], 0  ;;  %290 = vmatprep.subr.bf16.mxu0 %v289_v6  ;;  %294 = vmatprep.subr.bf16.mxu1 %v293_v10  ;;  %v301_v15 = vpack.c.bf16 %v123_v14, %v122_v13  ;;  %v22_v16 = vld [vmem:[%s433_s0 + $0x8] sm:$0xff]  ;;  %v124_v17 = vld [vmem:[%s436_s3 + $0x30] sm:$0xff]  ;;  %vm133_vm1 = vcmask 523264  }
   0x7   :  { %296 = vmatpush3.bf16.msra.mxu1 %v293_v10  ;;  %v125_v18 = vld [vmem:[%s436_s3 + $0x38] sm:$0xff]  ;;  %v233_v20 = vld [vmem:[%s435_s2] ss:$0 sm:$0xff]  ;;  %s336_s3 = smov [#allocation2]  }
   0x8   :  { %298 = vmatprep.subr.bf16.mxu1 %v297_v12  ;;  %v305_v19 = vpack.c.bf16 %v125_v18, %v124_v17  ;;  %v236_v27 = vld [vmem:[%s437_s4] ss:$0 sm:$0xff]  ;;  %s222_s23 = sshll.u32 %s336_s3, 4  ;;  %s223_s23 = int_to_ptr.vmem [resolvable:$true] %s222_s23 }
   0x9   :  { %292 = vmatpush3.bf16.msra.mxu0 %v289_v6  ;;  %s312_s2 = scalar_lea.vmem %s223_s23, 256  ;;  %p317_p1 = scmp.lt.s32.totalorder %s223_s23, %s223_s23 }
   0xa   :  { %p313_p0 = scmp.ne.s32.totalorder %s223_s23, %s312_s2  ;;  %p318_p2 = scmp.lt.s32.totalorder %s312_s2, %s312_s2 }
   0xb   :  { %300 = vmatpush3.bf16.msra.mxu1 %v297_v12 }
   0xc   :  { %264 = vmatmul.mubr.msk.f32.vlgmr.msra.gmra.mrb[0].mxu0 %vm34_vm0, %v22_v16  ;;  %302 = vmatprep.subr.bf16.mxu1 %v301_v15  ;;  %p319_p3 = por %p318_p2, %p317_p1 }
   0xe   :  { %p320_p4 = pnand %p319_p3, %p313_p0 }
   0xf   :  { %304 = vmatpush3.bf16.msra.mxu1 %v301_v15 }
  0x10   :  { %306 = vmatprep.subr.bf16.mxu1 %v305_v19 }
  0x13   :  { %308 = vmatpush3.bf16.msra.mxu1 %v305_v19 }
  0xdf   :  { %v265_v21 = vpop.f32.mrb[0].mxu0 }
  0xe0   :  { %v113_v22 = vadd.f32 %v265_v21, %v233_v20  ;;  %v107_v23 = vpop.f32.mrb[1].mxu0 }
  0xe1   :  { %v108_v24 = vadd.f32 %v233_v20, %v107_v23 }
  0xe2   :  { %v117_v26 = vmax.f32 %v113_v22, 0.0 }
  0xe3   :  { %v116_v25 = vmax.f32 %v108_v24, 0.0 }
  0xe5   :  { %282 = vmatprep.mubr.msk.f32.mxu1 %vm133_vm1, %v116_v25 }
  0xe6   :  { %283 = vmatmul.mubr.msk.f32.vlgmr.msra.gmra.mrb[0].mxu1 %vm133_vm1, %v117_v26 }
 0x1b9   :  { %v284_v28 = vpop.f32.mrb[0].mxu1 }
 0x1ba   :  { %v212_v29 = vadd.f32 %v284_v28, %v236_v27  ;;  %v206_v30 = vpop.f32.mrb[1].mxu1 }
 0x1bb   :  { %v207_v31 = vadd.f32 %v236_v27, %v206_v30 }
 0x1bc   :  { %216 = vst.msk [vmem:[#allocation2 + $0x8] sm:$0xff] %vm34_vm0, %v212_v29 }
 0x1bd   :  { %215 = vst.msk [vmem:[#allocation2] sm:$0xff] %vm34_vm0, %v207_v31 }
 0x1be   :  { %323 = shalt.err (!%p320_p4)
}
 0x1bf   :  { %s324_s25 = scalar_lea.hbm %s438_s5, 256 }
 0x1c0   :  { %p325_p5 = scmp.ne.s32.totalorder %s438_s5, %s324_s25  ;;  %p328_p6 = scmp.lt.u32.totalorder %s324_s25, %s438_s5 }
 0x1c2   :  { %p330_p7 = pnand %p328_p6, %p325_p5 }
 0x1c4   :  { %333 = shalt.err (!%p330_p7)
}
 0x1c5   :  { %s337_s30 = smov 128   ;;  %s338_s6 = smov 8  }
 0x1c6   :  { %228 = dma.vmem_to_hbm [thread:$0]  %s223_s23, 256, %s438_s5, [#allocation3], %s337_s30, %s337_s30, %s338_s6  }
 0x1c7   :  { %334 = dma.done.wait [#allocation3], 256  }
 0x1c8   :  { %335 = vsyncadd [#allocation3], 4294967040 }
 0x1c9   :  { %232 = vsyncpa [#allocation3], 1 }

</bundles_post_ra>
